<compile_context>
chip_gen: v5e
topology: v5e:2x2
jax: 0.10.0
libtpu: 0.0.40
codegen_flags: <defaults>
</compile_context>

<pallas_src>
import functools

import jax
import jax.numpy as jnp
from jax.experimental import pallas as pl
from jax.experimental.pallas import tpu as pltpu


# --------------------------------------------------------------------------- #
# Kernel
# --------------------------------------------------------------------------- #
def deconv_block_kernel(x_ref, m_ref, bias_ref, gamma_ref, beta_ref, o_ref,
                        *, gc, lo, lo_pad, n_batch, eps):
    """One channel-group of the fused DeconvBlock forward.

    x_ref     : [B, C2*L]          bf16   flattened input (resident across grid)
    m_ref     : [C2*L, gc*lo_pad]  bf16   fused (upsample+pad+deconv) weights
    bias_ref  : [1, gc*lo_pad]     f32    conv bias (zero in padded columns)
    gamma_ref : [1, gc*lo_pad]     f32    BN gamma (replicated per channel)
    beta_ref  : [1, gc*lo_pad]     f32    BN beta  (zero in padded columns)
    o_ref     : [B, gc*lo_pad]     f32    lane-dense output slab
    """
    x = x_ref[...]                                            # [B, K]           bf16
    m = m_ref[...]                                            # [K, gc*lo_pad]   bf16

    # Fused upsample + replicate-pad + zero-pad + k-tap transposed conv:
    # one MXU push, f32 accumulation; bias added in f32.
    y = jnp.dot(x, m, preferred_element_type=jnp.float32)     # [B, gc*lo_pad] f32
    y = y + bias_ref[...]                                     # bias is 0 in pad cols

    inv_n = 1.0 / float(n_batch * lo)

    # Per output channel (one 128-lane-aligned segment each): single-pass
    # BatchNorm statistics (sum / sum-of-squares; padded columns are exactly
    # zero so they contribute nothing).  The per-channel scale/shift rows are
    # assembled with a lane-aligned concat so the normalize+ReLU+store is a
    # single full-block pass (one unmasked wide store instead of gc partial
    # slice stores).
    scales, shifts = [], []
    for c in range(gc):                                       # gc small & static
        sl = slice(c * lo_pad, (c + 1) * lo_pad)
        yc = y[:, sl]                                         # [B, lo_pad]
        s = jnp.sum(yc, keepdims=True)                        # [1, 1]
        ss = jnp.sum(yc * yc, keepdims=True)                  # [1, 1]
        mean = s * inv_n
        var = ss * inv_n - mean * mean
        inv_std = jax.lax.rsqrt(var + eps)
        scale_c = gamma_ref[:, sl] * inv_std                  # [1, lo_pad]
        shift_c = beta_ref[:, sl] - mean * scale_c            # [1, lo_pad]
        scales.append(scale_c)
        shifts.append(shift_c)

    scale_full = jnp.concatenate(scales, axis=1)              # [1, gc*lo_pad]
    shift_full = jnp.concatenate(shifts, axis=1)              # [1, gc*lo_pad]
    o_ref[...] = jnp.maximum(y * scale_full + shift_full, 0.0).astype(o_ref.dtype)


# --------------------------------------------------------------------------- #
# Wrapper
# --------------------------------------------------------------------------- #
def deconv_block(x_flat, M, bias_vec, gamma_vec, beta_vec, *, out_channels,
                 lo, lo_pad, channel_group=4, eps=1e-5):
    """x_flat: [B, C2*L] bf16; returns [B, out_channels, Lo] f32."""
    B, K = x_flat.shape
    O = out_channels
    assert O % channel_group == 0
    n_grid = O // channel_group
    ng_cols = channel_group * lo_pad                          # multiple of 128 (and 256 here)

    kern = functools.partial(deconv_block_kernel, gc=channel_group, lo=lo,
                             lo_pad=lo_pad, n_batch=B, eps=eps)

    out_flat = pl.pallas_call(
        kern,
        out_shape=jax.ShapeDtypeStruct((B, O * lo_pad), jnp.float32),
        grid_spec=pltpu.PrefetchScalarGridSpec(
            num_scalar_prefetch=0,
            grid=(n_grid,),
            in_specs=[
                pl.BlockSpec((B, K), lambda g: (0, 0)),          # x: resident
                pl.BlockSpec((K, ng_cols), lambda g: (0, g)),    # fused weights
                pl.BlockSpec((1, ng_cols), lambda g: (0, g)),    # bias
                pl.BlockSpec((1, ng_cols), lambda g: (0, g)),    # gamma
                pl.BlockSpec((1, ng_cols), lambda g: (0, g)),    # beta
            ],
            out_specs=pl.BlockSpec((B, ng_cols), lambda g: (0, g)),
        ),
        compiler_params=pltpu.CompilerParams(
            dimension_semantics=("parallel",),
            vmem_limit_bytes=32 * 1024 * 1024),
    )(x_flat, M, bias_vec, gamma_vec, beta_vec)

    return out_flat.reshape(B, O, lo_pad)[:, :, :lo]


# --------------------------------------------------------------------------- #
# Wrapper-side precompute: fold all linear ops into one matrix
# --------------------------------------------------------------------------- #
def make_upsample_matrix(L, scale):
    """U [L, L_out] s.t. x @ U == F.interpolate(x, mode='linear', align_corners=True)."""
    L_out = L * scale
    pos = jnp.arange(L_out, dtype=jnp.float32) * (L - 1) / (L_out - 1)
    lo = jnp.clip(jnp.floor(pos).astype(jnp.int32), 0, L - 2)
    frac = pos - lo.astype(jnp.float32)
    hi = lo + 1
    U = (jax.nn.one_hot(lo, L, dtype=jnp.float32).T * (1.0 - frac)[None, :]
         + jax.nn.one_hot(hi, L, dtype=jnp.float32).T * frac[None, :])
    return U                                                   # [L, L_out]


def make_replicate_pad_matrix(L, L_out):
    """P [L, L_out] s.t. x @ P == F.pad(x, (0, L_out-L), mode='replicate')."""
    src = jnp.minimum(jnp.arange(L_out), L - 1)
    return jax.nn.one_hot(src, L, dtype=jnp.float32).T         # [L, L_out]


def build_fused_operands(W, Wc, bias, gamma, beta, *, L, scale, pad):
    """Fold upsample, replicate-pad and both ConvTranspose1d's into one matrix.

    W  : [cm, O, k]  ConvTranspose1d weight (PyTorch [in, out, k] layout)
    Wc : [nc, O, k]  conditional ConvTranspose1d weight (bias=False)
    Returns (M bf16 [C2*L, O*Lo_pad], bias_vec, gamma_vec, beta_vec, Lo, Lo_pad).
    """
    cm, O, k = W.shape
    nc = Wc.shape[0]
    L2 = L * scale
    Lo = L2 + (k - 1) - 2 * pad
    lo_pad = ((Lo + 127) // 128) * 128                         # lane-dense per channel

    U = make_upsample_matrix(L, scale)                         # [L, L2]
    P = make_replicate_pad_matrix(L, L2)                       # [L, L2]
    W_all = jnp.concatenate([W, Wc], axis=0)                   # [C2, O, k]

    # Dense transposed-conv operator:
    #   out[o, t] += xcat[c, t2] * W_all[c, o, t - t2 + pad]  when 0 <= t-t2+pad < k
    j = jnp.arange(Lo)[None, :] - jnp.arange(L2)[:, None] + pad          # [L2, Lo]
    valid = ((j >= 0) & (j < k)).astype(jnp.float32)
    jc = jnp.clip(j, 0, k - 1)
    D = W_all[:, :, jc] * valid[None, None]                    # [C2, O, L2, Lo]
    D = D.transpose(0, 2, 1, 3)                                # [C2, L2, O, Lo]

    # Per-channel length transform: upsample for main channels, replicate-pad
    # for the condition channels.
    T = jnp.concatenate([jnp.broadcast_to(U[None], (cm, L, L2)),
                         jnp.broadcast_to(P[None], (nc, L, L2))], axis=0)  # [C2, L, L2]

    M = jnp.einsum('cls,csot->clot', T, D)                     # [C2, L, O, Lo]
    M = jnp.pad(M, ((0, 0), (0, 0), (0, 0), (0, lo_pad - Lo)))  # zero padded cols
    M = M.reshape((cm + nc) * L, O * lo_pad)

    col_valid = (jnp.arange(lo_pad) < Lo).astype(jnp.float32)  # [lo_pad]
    bias_vec = (bias[:, None] * col_valid[None, :]).reshape(1, O * lo_pad)
    gamma_vec = jnp.broadcast_to(gamma[:, None], (O, lo_pad)).reshape(1, O * lo_pad)
    beta_vec = (beta[:, None] * col_valid[None, :]).reshape(1, O * lo_pad)

    return (M.astype(jnp.bfloat16),
            bias_vec.astype(jnp.float32),
            gamma_vec.astype(jnp.float32),
            beta_vec.astype(jnp.float32),
            Lo, lo_pad)


# --------------------------------------------------------------------------- #
# Demo + correctness checks
# --------------------------------------------------------------------------- #
if __name__ == "__main__":
    # Module hyper-parameters
    in_channels, out_channels, kernel_size = 4, 8, 3
    n_conditions, padding, pool_k = 2, 1, 2
    eps = 1e-5

    # Input sizes
    B, L = 2, 16
    C_total = in_channels + n_conditions                      # 6

    key = jax.random.PRNGKey(0)
    kx, kw, kwc, kb = jax.random.split(key, 4)

    x = jax.random.normal(kx, (B, C_total, L), dtype=jnp.float32)
    W = jax.random.normal(kw, (in_channels, out_channels, kernel_size),
                          dtype=jnp.float32) * 0.2
    Wc = jax.random.normal(kwc, (n_conditions, out_channels, kernel_size),
                           dtype=jnp.float32) * 0.2
    bias = jax.random.normal(kb, (out_channels,), dtype=jnp.float32) * 0.1
    gamma = jnp.ones((out_channels,), jnp.float32)             # BatchNorm1d default init
    beta = jnp.zeros((out_channels,), jnp.float32)

    M_bf16, bias_vec, gamma_vec, beta_vec, Lo, lo_pad = build_fused_operands(
        W, Wc, bias, gamma, beta, L=L, scale=pool_k, pad=padding)

    x_bf16 = x.reshape(B, C_total * L).astype(jnp.bfloat16)

    out = deconv_block(x_bf16, M_bf16, bias_vec, gamma_vec, beta_vec,
                       out_channels=out_channels, lo=Lo, lo_pad=lo_pad,
                       channel_group=4, eps=eps)
    out = jax.block_until_ready(out)

    # ---- reference 1: full-precision PyTorch-semantics pipeline ------------
    def reference_full(x):
        xm, cond = x[:, :in_channels, :], x[:, in_channels:, :]
        U = make_upsample_matrix(L, pool_k)
        xm_up = jnp.einsum('bcl,lo->bco', xm, U)
        pad_len = xm_up.shape[-1] - cond.shape[-1]
        cond_pad = jnp.concatenate(
            [cond, jnp.broadcast_to(cond[:, :, -1:], (B, n_conditions, pad_len))],
            axis=-1)
        xcat = jnp.concatenate([xm_up, cond_pad], axis=1)
        W_all = jnp.concatenate([W, Wc], axis=0)               # [C2, O, k]
        pp = kernel_size - 1 - padding
        xpad = jnp.pad(xcat, ((0, 0), (0, 0), (pp, pp)))
        Wf = jnp.flip(W_all, axis=2).transpose(2, 1, 0)        # [k, O, C2]
        o = sum(jnp.einsum('oc,bcl->bol', Wf[j], xpad[:, :, j:j + Lo])
                for j in range(kernel_size)) + bias[None, :, None]
        m = jnp.mean(o, axis=(0, 2), keepdims=True)
        v = jnp.mean((o - m) ** 2, axis=(0, 2), keepdims=True)
        o = (o - m) / jnp.sqrt(v + eps) * gamma[None, :, None] + beta[None, :, None]
        return jnp.maximum(o, 0.0)

    ref_full = reference_full(x)

    # ---- reference 2: same bf16-quantized operands, same BN formula --------
    def reference_bf16():
        xf = x_bf16.astype(jnp.float32)
        Mf = M_bf16.astype(jnp.float32)
        y = (xf @ Mf + bias_vec).reshape(B, out_channels, lo_pad)
        n = B * Lo
        s = jnp.sum(y, axis=(0, 2), keepdims=True)
        ss = jnp.sum(y * y, axis=(0, 2), keepdims=True)
        mean = s / n
        var = ss / n - mean * mean
        scale = gamma[None, :, None] * jax.lax.rsqrt(var + eps)
        shift = beta[None, :, None] - mean * scale
        return jnp.maximum(y * scale + shift, 0.0)[:, :, :Lo]

    ref_bf16 = reference_bf16()

    assert out.shape == (B, out_channels, Lo)
    assert bool(jnp.all(jnp.isfinite(out)))
    # Kernel vs reference computed from the SAME bf16-quantized operands:
    assert bool(jnp.allclose(out, ref_bf16, rtol=2e-3, atol=2e-3)), \
        float(jnp.max(jnp.abs(out - ref_bf16)))
    # Kernel vs full-f32 PyTorch-semantics reference (bf16 quantization slack):
    assert bool(jnp.allclose(out, ref_full, rtol=3e-2, atol=3e-2)), \
        float(jnp.max(jnp.abs(out - ref_full)))

    print("KERNEL_OK")
</pallas_src>

<mosaic_0001>
module attributes {stable_mosaic.version = 11 : i64} {
  func.func @deconv_block_kernel(%arg0: i32, %arg1: memref<2x96xbf16, #tpu.memory_space<vmem>>, %arg2: memref<96x512xbf16, #tpu.memory_space<vmem>>, %arg3: memref<1x512xf32, #tpu.memory_space<vmem>>, %arg4: memref<1x512xf32, #tpu.memory_space<vmem>>, %arg5: memref<1x512xf32, #tpu.memory_space<vmem>>, %arg6: memref<2x512xf32, #tpu.memory_space<vmem>>) attributes {dimension_semantics = [#tpu.dimension_semantics<parallel>], iteration_bounds = array<i64: 2>, scalar_prefetch = 0 : i64, scratch_operands = 0 : i64, tpu.core_type = #tpu.core_type<tc>, window_params = [{pipeline_mode = #tpu.pipeline_mode<synchronous>, transform_indices = @transform_0, window_bounds = array<i64: 2, 96>}, {transform_indices = @transform_1, window_bounds = array<i64: 96, 512>}, {transform_indices = @transform_2, window_bounds = array<i64: 1, 512>}, {transform_indices = @transform_3, window_bounds = array<i64: 1, 512>}, {transform_indices = @transform_4, window_bounds = array<i64: 1, 512>}, {transform_indices = @transform_5, window_bounds = array<i64: 2, 512>}]} {
    %c0 = arith.constant 0 : index
    %c0_0 = arith.constant 0 : index
    %0 = vector.load %arg1[%c0, %c0_0] : memref<2x96xbf16, #tpu.memory_space<vmem>>, vector<2x96xbf16>
    %c0_1 = arith.constant 0 : index
    %c0_2 = arith.constant 0 : index
    %1 = vector.load %arg2[%c0_1, %c0_2] : memref<96x512xbf16, #tpu.memory_space<vmem>>, vector<96x512xbf16>
    %cst = arith.constant dense<0.000000e+00> : vector<2x512xf32>
    %2 = tpu.matmul %0, %1, %cst {dimension_numbers = #tpu.dot_dimension_numbers<[1], [0], [0], [1], [0, 0, 1, 1], [], []>} : vector<2x96xbf16>, vector<96x512xbf16>, vector<2x512xf32> -> vector<2x512xf32>
    %c0_3 = arith.constant 0 : index
    %c0_4 = arith.constant 0 : index
    %3 = vector.load %arg3[%c0_3, %c0_4] : memref<1x512xf32, #tpu.memory_space<vmem>>, vector<1x512xf32>
    %4 = vector.broadcast %3 : vector<1x512xf32> to vector<2x512xf32>
    %5 = arith.addf %2, %4 : vector<2x512xf32>
    %6 = vector.extract_strided_slice %5 {offsets = [0, 0], sizes = [2, 128], strides = [1, 1]} : vector<2x512xf32> to vector<2x128xf32>
    %7 = vector.shape_cast %6 : vector<2x128xf32> to vector<1x2x128xf32>
    %cst_5 = arith.constant dense<0.000000e+00> : vector<1xf32>
    %8 = vector.multi_reduction <add>, %7, %cst_5 [1, 2] : vector<1x2x128xf32> to vector<1xf32>
    %9 = vector.shape_cast %8 : vector<1xf32> to vector<1x1x1xf32>
    %10 = vector.extract %9[0, 0, 0] : f32 from vector<1x1x1xf32>
    %11 = vector.broadcast %10 : f32 to vector<1x1xf32>
    %12 = arith.mulf %6, %6 : vector<2x128xf32>
    %13 = vector.shape_cast %12 : vector<2x128xf32> to vector<1x2x128xf32>
    %cst_6 = arith.constant dense<0.000000e+00> : vector<1xf32>
    %14 = vector.multi_reduction <add>, %13, %cst_6 [1, 2] : vector<1x2x128xf32> to vector<1xf32>
    %15 = vector.shape_cast %14 : vector<1xf32> to vector<1x1x1xf32>
    %16 = vector.extract %15[0, 0, 0] : f32 from vector<1x1x1xf32>
    %17 = vector.broadcast %16 : f32 to vector<1x1xf32>
    %cst_7 = arith.constant 1.562500e-02 : f32
    %18 = vector.broadcast %cst_7 : f32 to vector<1x1xf32>
    %19 = arith.mulf %11, %18 : vector<1x1xf32>
    %cst_8 = arith.constant 1.562500e-02 : f32
    %20 = vector.broadcast %cst_8 : f32 to vector<1x1xf32>
    %21 = arith.mulf %17, %20 : vector<1x1xf32>
    %22 = arith.mulf %19, %19 : vector<1x1xf32>
    %23 = arith.subf %21, %22 : vector<1x1xf32>
    %cst_9 = arith.constant 9.99999974E-6 : f32
    %24 = vector.broadcast %cst_9 : f32 to vector<1x1xf32>
    %25 = arith.addf %23, %24 : vector<1x1xf32>
    %26 = math.rsqrt %25 : vector<1x1xf32>
    %c0_10 = arith.constant 0 : index
    %c0_11 = arith.constant 0 : index
    %27 = vector.load %arg4[%c0_10, %c0_11] : memref<1x512xf32, #tpu.memory_space<vmem>>, vector<1x128xf32>
    %28 = vector.broadcast %26 : vector<1x1xf32> to vector<1x128xf32>
    %29 = arith.mulf %27, %28 : vector<1x128xf32>
    %c0_12 = arith.constant 0 : index
    %c0_13 = arith.constant 0 : index
    %30 = vector.load %arg5[%c0_12, %c0_13] : memref<1x512xf32, #tpu.memory_space<vmem>>, vector<1x128xf32>
    %31 = vector.broadcast %19 : vector<1x1xf32> to vector<1x128xf32>
    %32 = arith.mulf %31, %29 : vector<1x128xf32>
    %33 = arith.subf %30, %32 : vector<1x128xf32>
    %34 = vector.extract_strided_slice %5 {offsets = [0, 128], sizes = [2, 128], strides = [1, 1]} : vector<2x512xf32> to vector<2x128xf32>
    %35 = vector.shape_cast %34 : vector<2x128xf32> to vector<1x2x128xf32>
    %cst_14 = arith.constant dense<0.000000e+00> : vector<1xf32>
    %36 = vector.multi_reduction <add>, %35, %cst_14 [1, 2] : vector<1x2x128xf32> to vector<1xf32>
    %37 = vector.shape_cast %36 : vector<1xf32> to vector<1x1x1xf32>
    %38 = vector.extract %37[0, 0, 0] : f32 from vector<1x1x1xf32>
    %39 = vector.broadcast %38 : f32 to vector<1x1xf32>
    %40 = arith.mulf %34, %34 : vector<2x128xf32>
    %41 = vector.shape_cast %40 : vector<2x128xf32> to vector<1x2x128xf32>
    %cst_15 = arith.constant dense<0.000000e+00> : vector<1xf32>
    %42 = vector.multi_reduction <add>, %41, %cst_15 [1, 2] : vector<1x2x128xf32> to vector<1xf32>
    %43 = vector.shape_cast %42 : vector<1xf32> to vector<1x1x1xf32>
    %44 = vector.extract %43[0, 0, 0] : f32 from vector<1x1x1xf32>
    %45 = vector.broadcast %44 : f32 to vector<1x1xf32>
    %cst_16 = arith.constant 1.562500e-02 : f32
    %46 = vector.broadcast %cst_16 : f32 to vector<1x1xf32>
    %47 = arith.mulf %39, %46 : vector<1x1xf32>
    %cst_17 = arith.constant 1.562500e-02 : f32
    %48 = vector.broadcast %cst_17 : f32 to vector<1x1xf32>
    %49 = arith.mulf %45, %48 : vector<1x1xf32>
    %50 = arith.mulf %47, %47 : vector<1x1xf32>
    %51 = arith.subf %49, %50 : vector<1x1xf32>
    %cst_18 = arith.constant 9.99999974E-6 : f32
    %52 = vector.broadcast %cst_18 : f32 to vector<1x1xf32>
    %53 = arith.addf %51, %52 : vector<1x1xf32>
    %54 = math.rsqrt %53 : vector<1x1xf32>
    %c0_19 = arith.constant 0 : index
    %c128 = arith.constant 128 : index
    %55 = vector.load %arg4[%c0_19, %c128] : memref<1x512xf32, #tpu.memory_space<vmem>>, vector<1x128xf32>
    %56 = vector.broadcast %54 : vector<1x1xf32> to vector<1x128xf32>
    %57 = arith.mulf %55, %56 : vector<1x128xf32>
    %c0_20 = arith.constant 0 : index
    %c128_21 = arith.constant 128 : index
    %58 = vector.load %arg5[%c0_20, %c128_21] : memref<1x512xf32, #tpu.memory_space<vmem>>, vector<1x128xf32>
    %59 = vector.broadcast %47 : vector<1x1xf32> to vector<1x128xf32>
    %60 = arith.mulf %59, %57 : vector<1x128xf32>
    %61 = arith.subf %58, %60 : vector<1x128xf32>
    %62 = vector.extract_strided_slice %5 {offsets = [0, 256], sizes = [2, 128], strides = [1, 1]} : vector<2x512xf32> to vector<2x128xf32>
    %63 = vector.shape_cast %62 : vector<2x128xf32> to vector<1x2x128xf32>
    %cst_22 = arith.constant dense<0.000000e+00> : vector<1xf32>
    %64 = vector.multi_reduction <add>, %63, %cst_22 [1, 2] : vector<1x2x128xf32> to vector<1xf32>
    %65 = vector.shape_cast %64 : vector<1xf32> to vector<1x1x1xf32>
    %66 = vector.extract %65[0, 0, 0] : f32 from vector<1x1x1xf32>
    %67 = vector.broadcast %66 : f32 to vector<1x1xf32>
    %68 = arith.mulf %62, %62 : vector<2x128xf32>
    %69 = vector.shape_cast %68 : vector<2x128xf32> to vector<1x2x128xf32>
    %cst_23 = arith.constant dense<0.000000e+00> : vector<1xf32>
    %70 = vector.multi_reduction <add>, %69, %cst_23 [1, 2] : vector<1x2x128xf32> to vector<1xf32>
    %71 = vector.shape_cast %70 : vector<1xf32> to vector<1x1x1xf32>
    %72 = vector.extract %71[0, 0, 0] : f32 from vector<1x1x1xf32>
    %73 = vector.broadcast %72 : f32 to vector<1x1xf32>
    %cst_24 = arith.constant 1.562500e-02 : f32
    %74 = vector.broadcast %cst_24 : f32 to vector<1x1xf32>
    %75 = arith.mulf %67, %74 : vector<1x1xf32>
    %cst_25 = arith.constant 1.562500e-02 : f32
    %76 = vector.broadcast %cst_25 : f32 to vector<1x1xf32>
    %77 = arith.mulf %73, %76 : vector<1x1xf32>
    %78 = arith.mulf %75, %75 : vector<1x1xf32>
    %79 = arith.subf %77, %78 : vector<1x1xf32>
    %cst_26 = arith.constant 9.99999974E-6 : f32
    %80 = vector.broadcast %cst_26 : f32 to vector<1x1xf32>
    %81 = arith.addf %79, %80 : vector<1x1xf32>
    %82 = math.rsqrt %81 : vector<1x1xf32>
    %c0_27 = arith.constant 0 : index
    %c256 = arith.constant 256 : index
    %83 = vector.load %arg4[%c0_27, %c256] : memref<1x512xf32, #tpu.memory_space<vmem>>, vector<1x128xf32>
    %84 = vector.broadcast %82 : vector<1x1xf32> to vector<1x128xf32>
    %85 = arith.mulf %83, %84 : vector<1x128xf32>
    %c0_28 = arith.constant 0 : index
    %c256_29 = arith.constant 256 : index
    %86 = vector.load %arg5[%c0_28, %c256_29] : memref<1x512xf32, #tpu.memory_space<vmem>>, vector<1x128xf32>
    %87 = vector.broadcast %75 : vector<1x1xf32> to vector<1x128xf32>
    %88 = arith.mulf %87, %85 : vector<1x128xf32>
    %89 = arith.subf %86, %88 : vector<1x128xf32>
    %90 = vector.extract_strided_slice %5 {offsets = [0, 384], sizes = [2, 128], strides = [1, 1]} : vector<2x512xf32> to vector<2x128xf32>
    %91 = vector.shape_cast %90 : vector<2x128xf32> to vector<1x2x128xf32>
    %cst_30 = arith.constant dense<0.000000e+00> : vector<1xf32>
    %92 = vector.multi_reduction <add>, %91, %cst_30 [1, 2] : vector<1x2x128xf32> to vector<1xf32>
    %93 = vector.shape_cast %92 : vector<1xf32> to vector<1x1x1xf32>
    %94 = vector.extract %93[0, 0, 0] : f32 from vector<1x1x1xf32>
    %95 = vector.broadcast %94 : f32 to vector<1x1xf32>
    %96 = arith.mulf %90, %90 : vector<2x128xf32>
    %97 = vector.shape_cast %96 : vector<2x128xf32> to vector<1x2x128xf32>
    %cst_31 = arith.constant dense<0.000000e+00> : vector<1xf32>
    %98 = vector.multi_reduction <add>, %97, %cst_31 [1, 2] : vector<1x2x128xf32> to vector<1xf32>
    %99 = vector.shape_cast %98 : vector<1xf32> to vector<1x1x1xf32>
    %100 = vector.extract %99[0, 0, 0] : f32 from vector<1x1x1xf32>
    %101 = vector.broadcast %100 : f32 to vector<1x1xf32>
    %cst_32 = arith.constant 1.562500e-02 : f32
    %102 = vector.broadcast %cst_32 : f32 to vector<1x1xf32>
    %103 = arith.mulf %95, %102 : vector<1x1xf32>
    %cst_33 = arith.constant 1.562500e-02 : f32
    %104 = vector.broadcast %cst_33 : f32 to vector<1x1xf32>
    %105 = arith.mulf %101, %104 : vector<1x1xf32>
    %106 = arith.mulf %103, %103 : vector<1x1xf32>
    %107 = arith.subf %105, %106 : vector<1x1xf32>
    %cst_34 = arith.constant 9.99999974E-6 : f32
    %108 = vector.broadcast %cst_34 : f32 to vector<1x1xf32>
    %109 = arith.addf %107, %108 : vector<1x1xf32>
    %110 = math.rsqrt %109 : vector<1x1xf32>
    %c0_35 = arith.constant 0 : index
    %c384 = arith.constant 384 : index
    %111 = vector.load %arg4[%c0_35, %c384] : memref<1x512xf32, #tpu.memory_space<vmem>>, vector<1x128xf32>
    %112 = vector.broadcast %110 : vector<1x1xf32> to vector<1x128xf32>
    %113 = arith.mulf %111, %112 : vector<1x128xf32>
    %c0_36 = arith.constant 0 : index
    %c384_37 = arith.constant 384 : index
    %114 = vector.load %arg5[%c0_36, %c384_37] : memref<1x512xf32, #tpu.memory_space<vmem>>, vector<1x128xf32>
    %115 = vector.broadcast %103 : vector<1x1xf32> to vector<1x128xf32>
    %116 = arith.mulf %115, %113 : vector<1x128xf32>
    %117 = arith.subf %114, %116 : vector<1x128xf32>
    %118 = tpu.concatenate %29, %57, %85, %113 in 1 : vector<1x128xf32>, vector<1x128xf32>, vector<1x128xf32>, vector<1x128xf32> -> vector<1x512xf32>
    %119 = tpu.concatenate %33, %61, %89, %117 in 1 : vector<1x128xf32>, vector<1x128xf32>, vector<1x128xf32>, vector<1x128xf32> -> vector<1x512xf32>
    %120 = vector.broadcast %118 : vector<1x512xf32> to vector<2x512xf32>
    %121 = arith.mulf %5, %120 : vector<2x512xf32>
    %122 = vector.broadcast %119 : vector<1x512xf32> to vector<2x512xf32>
    %123 = arith.addf %121, %122 : vector<2x512xf32>
    %cst_38 = arith.constant 0.000000e+00 : f32
    %124 = vector.broadcast %cst_38 : f32 to vector<2x512xf32>
    %125 = arith.maximumf %123, %124 : vector<2x512xf32>
    %c0_39 = arith.constant 0 : index
    %c0_40 = arith.constant 0 : index
    %126 = vector.load %arg6[%c0_39, %c0_40] : memref<2x512xf32, #tpu.memory_space<vmem>>, vector<2x512xf32>
    tpu.vector_store %arg6[%c0_39, %c0_40], %125 {strides = array<i32>} : memref<2x512xf32, #tpu.memory_space<vmem>>, vector<2x512xf32>,
    return
  }
  func.func @transform_0(%arg0: i32) -> (i32, i32) {
    %c0_i32 = arith.constant 0 : i32
    %c0_i32_0 = arith.constant 0 : i32
    %c0_i32_1 = arith.constant 0 : i32
    return %c0_i32, %c0_i32_0 : i32, i32
  }
  func.func @transform_1(%arg0: i32) -> (i32, i32) {
    %c0_i32 = arith.constant 0 : i32
    %c0_i32_0 = arith.constant 0 : i32
    return %c0_i32, %arg0 : i32, i32
  }
  func.func @transform_2(%arg0: i32) -> (i32, i32) {
    %c0_i32 = arith.constant 0 : i32
    %c0_i32_0 = arith.constant 0 : i32
    return %c0_i32, %arg0 : i32, i32
  }
  func.func @transform_3(%arg0: i32) -> (i32, i32) {
    %c0_i32 = arith.constant 0 : i32
    %c0_i32_0 = arith.constant 0 : i32
    return %c0_i32, %arg0 : i32, i32
  }
  func.func @transform_4(%arg0: i32) -> (i32, i32) {
    %c0_i32 = arith.constant 0 : i32
    %c0_i32_0 = arith.constant 0 : i32
    return %c0_i32, %arg0 : i32, i32
  }
  func.func @transform_5(%arg0: i32) -> (i32, i32) {
    %c0_i32 = arith.constant 0 : i32
    %c0_i32_0 = arith.constant 0 : i32
    return %c0_i32, %arg0 : i32, i32
  }
}

</mosaic_0001>

<bundles_post_ra>
// kernel: tpu_custom_call.1
= control target key start
LH: loop header
LB: loop body
LE: loop exit
PB: predicated region body
PF: predicated region fallthrough
CT: control target
= control target key end

     0   :  { %s1800_s0 = inlined_call_operand.hbm [shape: bf16[2,96], index: 0, kind: input, shape index: {}]   ;;  %s1801_s1 = inlined_call_operand.hbm [shape: bf16[96,1024], index: 1, kind: input, shape index: {}]   ;;  %s1802_s2 = inlined_call_operand.hbm [shape: f32[1,1024], index: 2, kind: input, shape index: {}]   ;;  %s1803_s3 = inlined_call_operand.hbm [shape: f32[1,1024], index: 3, kind: input, shape index: {}]   ;;  %s1804_s4 = inlined_call_operand.hbm [shape: f32[1,1024], index: 4, kind: input, shape index: {}]   ;;  %s1805_s5 = inlined_call_operand.hbm [shape: f32[2,1024], index: 5, kind: output, shape index: {}]  }
   0x1   :  { %1807 = sst [smem:[#allocation17_spill]] %s1800_s0 }
   0x2   :  { %1808 = sst [smem:[#allocation18_spill]] %s1801_s1 }
   0x3   :  { %1809 = sst [smem:[#allocation19_spill]] %s1803_s3 }
   0x4   :  { %10 = vsyncpa [#allocation3], 0 }
   0x5   :  { %11 = vsyncpa [#allocation6], 0 }
   0x6   :  { %13 = vsyncpa [#allocation6 + $0x1], 0 }
   0x7   :  { %14 = vsyncpa [#allocation9], 0 }
   0x8   :  { %16 = vsyncpa [#allocation9 + $0x1], 0 }
   0x9   :  { %17 = vsyncpa [#allocation4], 0 }
   0xa   :  { %19 = vsyncpa [#allocation4 + $0x1], 0  ;;  %s1467_s18 = smov 0   ;;  %s1469_s19 = smov 0  }
   0xb   :  { %s1471_s20 = smov 0   ;;  %s1473_s21 = smov 0  }
   0xc LB: > { %s1488_s22 = sadd.s32 1, %s1431_s21   ;;  %s53_s23 = sadd.s32 1, %s1427_s20  ;;  %s1431_s21 = sphi %s1473_s21, %s1826_s21   ;;  %s1427_s20 = sphi %s1471_s20, %s1825_s20   ;;  %s1423_s19 = sphi %s1469_s19, %s1824_s19   ;;  %s1419_s18 = sphi %s1467_s18, %s1823_s18  }
   0xd   : > { %s50_s24 = ssub.s32 %s1431_s21, %s1488_s22  ;;  %p60_p0 = scmp.ne.s32.totalorder %s1427_s20, %s1423_s19 }
   0xe   : > { %p51_p1 = scmp.eq.s32.totalorder %s50_s24, 0  ;;  %p61_p2 = scmp.eq.s32.totalorder %s1431_s21, 0 }
   0xf   : > { %p1160_p4 = scmp.lt.s32.totalorder %s1431_s21, 2  ;;  %s206_s26 = sand.u32 1, %s1431_s21  }
  0x10   : > { %s1499_s25 = scalar_select %p51_p1, %s1427_s20, %s53_s23  }
  0x11   : > { %p62_p5 = por %p61_p2, %p60_p0  ;;  %s208_s27 = sand.u32 1, %s1427_s20  }
  0x12   : > { %1810 = sst [smem:[#allocation16_spill]] %s1499_s25  ;;  %s1106_s28 = smul.u32 192, %s208_s27 }
  0x13   : > { %s1080_s29 = sshll.u32 %s1431_s21, 4  ;;  %s1811_s1 = sld [smem:[#allocation18_spill]] }
  0x14   : > { %p1510_p6 = pnand %p1160_p4, %p62_p5  ;;  %s210_s10 = scalar_lea.vmem [#allocation5], %s1106_s28 }
  0x15   : > { %s218_s11 = sshll.u32 %s210_s10, 4  ;;  %s1514_s12 = sshll.u32 %s208_s27, 2  ;;  %s219_s11 = int_to_ptr.vmem [resolvable:$true] %s218_s11 }
  0x16   : > { %s1518_s13 = scalar_lea.sflag [#allocation6], %s206_s26  ;;  %p1211_p8 = pneg %p1510_p6 }
  0x19   : > { %s215_s7 = scalar_lea.hbm %s1811_s1, %s1080_s29  ;;  %s1214_s23 = scalar_lea.hbm %s1811_s1, 384 }
  0x1a   : > { %s216_s9 = sshll.u32 %s215_s7, 4  ;;  %s217_s9 = int_to_ptr.hbm [resolvable:$true] %s216_s9 }
  0x1b   : > { %s1207_s14 = sshra.s32 %s217_s9, 4  ;;  %s1208_s14 = int_to_ptr.hbm [resolvable:$true] %s1207_s14 }
  0x1c   : > { %s1209_s15 = scalar_lea.hbm %s1208_s14, 192  ;;  %p1215_p11 = scmp.lt.s32.totalorder %s1208_s14, %s1811_s1 }
  0x1d   : > { %p1210_p7 = scmp.ne.s32.totalorder %s1208_s14, %s1209_s15  ;;  %p1216_p12 = scmp.lt.s32.totalorder %s1214_s23, %s1209_s15 }
  0x1f   : > { %p1212_p9 = pnand %p1211_p8, %p1210_p7  ;;  %p1217_p13 = por %p1216_p12, %p1215_p11 }
  0x21   : > { %p1213_p10 = pneg %p1212_p9 }
  0x23   : > { %p1218_p1 = pnand %p1217_p13, %p1213_p10 }
  0x25   : > { %1221 = shalt.err (!%p1218_p1)
}
  0x26   : > { %s1433_s28 = smov 512   ;;  %s1434_s29 = smov 256  }
  0x27   : > { %s1435_s30 = smov 16   ;;  %s1535_s6 = sshll.u32 %s1431_s21, 2 }
  0x28   : > { %1145 = dma.hbm_to_vmem [thread:$0]  (!%p1510_p6), %s217_s9, 3072, %s219_s11, %s1518_s13, %s1433_s28, %s1434_s29, %s1435_s30  }
  0x29   : > { %s1813_s3 = sld [smem:[#allocation19_spill]]  ;;  %s251_s16 = scalar_lea.vmem [#allocation8], %s1514_s12 }
  0x2a   : > { %s259_s17 = sshll.u32 %s251_s16, 4  ;;  %s1544_s23 = scalar_lea.sflag [#allocation9], %s206_s26  ;;  %s260_s17 = int_to_ptr.vmem [resolvable:$true] %s259_s17 }
  0x2f   : > { %s255_s14 = scalar_lea.hbm %s1813_s3, %s1535_s6  ;;  %s1244_s28 = scalar_lea.hbm %s1813_s3, 8 }
  0x30   : > { %s257_s15 = sshll.u32 %s255_s14, 4  ;;  %s258_s15 = int_to_ptr.hbm [resolvable:$true] %s257_s15 }
  0x31   : > { %s1237_s24 = sshra.s32 %s258_s15, 4  ;;  %s1238_s24 = int_to_ptr.hbm [resolvable:$true] %s1237_s24 }
  0x32   : > { %s1239_s27 = scalar_lea.hbm %s1238_s24, 4  ;;  %p1245_p7 = scmp.lt.s32.totalorder %s1238_s24, %s1813_s3 }
  0x33   : > { %p1240_p2 = scmp.ne.s32.totalorder %s1238_s24, %s1239_s27  ;;  %p1246_p9 = scmp.lt.s32.totalorder %s1244_s28, %s1239_s27 }
  0x35   : > { %p1242_p4 = pnand %p1240_p2, %p1211_p8  ;;  %p1247_p10 = por %p1246_p9, %p1245_p7 }
  0x37   : > { %p1243_p5 = pneg %p1242_p4 }
  0x39   : > { %p1248_p11 = pnand %p1247_p10, %p1243_p5 }
  0x3b   : > { %1251 = shalt.err (!%p1248_p11)
}
  0x3c   : > { %1151 = dma.hbm_to_vmem [thread:$0]  (!%p1510_p6), %s258_s15, 64, %s260_s17, %s1544_s23  }
  0x3d   : > { %s1559_s26 = sadd.s32 4294967295, %s1431_s21   ;;  %s957_s7 = sadd.s32 4294967294, %s1431_s21  }
  0x3e   : > { %p66_p12 = scmp.ne.s32.totalorder %s1423_s19, %s1419_s18  ;;  %p1806_p13 = scmp.eq.s32.totalorder %s1559_s26, 0 }
  0x3f   : > { %p168_p1 = scmp.eq.s32.totalorder %s1559_s26, 1  ;;  %p174_p2 = scmp.eq.s32.totalorder %s957_s7, 1 }
  0x40   : > { %p1568_p4 = por %p1806_p13, %p66_p12  ;;  %p958_p5 = scmp.ge.s32.totalorder %s1431_s21, 1 }
  0x41   : > { %p1576_p7 = por %p168_p1, %p60_p0  ;;  %p1580_p9 = por %p174_p2, %p66_p12 }
  0x42   : > { %p181_p10 = scmp.lt.s32.totalorder %s1431_s21, 3  ;;  %s1817_s0 = sld [smem:[#allocation17_spill]] }
  0x43   : > { %s1436_s9 = smov [#allocation2]   ;;  %s236_s30 = scalar_lea.hbm %s1802_s2, %s1535_s6 }
  0x44   : > { %p1588_p11 = pnand %p958_p5, %p181_p10  ;;  %s195_s11 = sshll.u32 %s1436_s9, 4  ;;  %s196_s11 = int_to_ptr.vmem [resolvable:$true] %s195_s11 }
  0x45   : > { %s232_s7 = scalar_lea.vmem [#allocation7], %s1514_s12  ;;  %s238_s16 = sshll.u32 %s236_s30, 4  ;;  %s239_s16 = int_to_ptr.hbm [resolvable:$true] %s238_s16 }
  0x46   : > { %p1138_p0 = pneg %p1588_p11  ;;  %s240_s1 = sshll.u32 %s232_s7, 4  ;;  %s241_s1 = int_to_ptr.vmem [resolvable:$true] %s240_s1 }
  0x47   : > { %s1297_s17 = sshra.s32 %s239_s16, 4  ;;  %s1304_s28 = scalar_lea.hbm %s1802_s2, 8  ;;  %s1298_s17 = int_to_ptr.hbm [resolvable:$true] %s1297_s17 }
  0x48   : > { %s193_s24 = sshll.u32 %s1817_s0, 4  ;;  %p1139_p12 = pnand %p1138_p0, %p1806_p13  ;;  %s194_s24 = int_to_ptr.hbm [resolvable:$true] %s193_s24 }
  0x49   : > { %s1299_s0 = scalar_lea.hbm %s1298_s17, 4  ;;  %p1305_p10 = scmp.lt.s32.totalorder %s1298_s17, %s1802_s2 }
  0x4a   : > { %1141 = dma.hbm_to_vmem [thread:$0]  (!%p1139_p12), %s194_s24, 16, %s196_s11, [#allocation3]  }
  0x4b   : > { %p1300_p1 = scmp.ne.s32.totalorder %s1298_s17, %s1299_s0  ;;  %p1306_p0 = scmp.lt.s32.totalorder %s1304_s28, %s1299_s0 }
  0x4d   : > { %p1302_p2 = pnand %p1300_p1, %p1211_p8  ;;  %p1307_p3 = por %p1306_p0, %p1305_p10 }
  0x4f   : > { %p1303_p5 = pneg %p1302_p2 }
  0x51   : > { %p1308_p13 = pnand %p1307_p3, %p1303_p5 }
  0x53   : > { %1311 = shalt.err (!%p1308_p13)
}
  0x54   : > { %1148 = dma.hbm_to_vmem [thread:$0]  (!%p1510_p6), %s239_s16, 64, %s241_s1, %s1518_s13  }
  0x55   : > { %s274_s3 = scalar_lea.hbm %s1804_s4, %s1535_s6  ;;  %s270_s30 = scalar_lea.vmem [#allocation10], %s1514_s12 }
  0x56   : > { %s278_s9 = sshll.u32 %s270_s30, 4  ;;  %s276_s25 = sshll.u32 %s274_s3, 4  ;;  %s279_s9 = int_to_ptr.vmem [resolvable:$true] %s278_s9  ;;  %s277_s25 = int_to_ptr.hbm [resolvable:$true] %s276_s25 }
  0x57   : > { %s1327_s0 = sshra.s32 %s277_s25, 4  ;;  %s1334_s1 = scalar_lea.hbm %s1804_s4, 8  ;;  %s1328_s0 = int_to_ptr.hbm [resolvable:$true] %s1327_s0 }
  0x58   : > { %s1329_s17 = scalar_lea.hbm %s1328_s0, 4  ;;  %p1335_p1 = scmp.lt.s32.totalorder %s1328_s0, %s1804_s4 }
  0x59   : > { %p1330_p3 = scmp.ne.s32.totalorder %s1328_s0, %s1329_s17  ;;  %p1336_p2 = scmp.lt.s32.totalorder %s1334_s1, %s1329_s17 }
  0x5b   : > { %p1332_p13 = pnand %p1330_p3, %p1211_p8  ;;  %p1337_p5 = por %p1336_p2, %p1335_p1 }
  0x5d   : > { %p1333_p12 = pneg %p1332_p13 }
  0x5f   : > { %p1338_p10 = pnand %p1337_p5, %p1333_p12 }
  0x61   : > { %1341 = shalt.err (!%p1338_p10)
}
  0x62   : > { %1154 = dma.hbm_to_vmem [thread:$0]  (!%p1510_p6), %s277_s25, 64, %s279_s9, %s1544_s23  }
  0x63   : > { %287 = sbr.rel (%p1588_p11) target bundleno = 509 (0x1fd), region = 40  ;;  %p1819_p8 = scmp.eq.s32.totalorder (!%p1588_p11), %s1559_s26, 0 }
  0x68   : > { %1402 = dma.done.wait (%p1819_p8), [#allocation3], 16   ;;  %p1820_p0 = pmov %p1819_p8 }
  0x69   : > { %s294_s12 = sand.u32 1, %s1559_s26   ;;  %s1638_s6 = sand.u32 1, %s1423_s19  }
  0x6a   : > { %1404 = vsyncadd (%p1820_p0), [#allocation3], 4294967280  ;;  %s1107_s7 = smul.u32 192, %s1638_s6  ;;  %s295_s8 = scalar_lea.sflag [#allocation6], %s294_s12 }
  0x6c   : > { %s1641_s24 = scalar_lea.vmem [#allocation5], %s1107_s7 }
  0x6d   : > { %1406 = dma.done.wait (%p1568_p4), %s295_s8, 3136  }
  0x6e   : > { %1408 = vsyncadd (%p1568_p4), %s295_s8, 4294964160  ;;  %s1648_s25 = sshll.u32 %s1638_s6, 2  ;;  %s315_s27 = scalar_lea.sflag [#allocation9], %s294_s12 }
  0x6f   : > { %s308_s23 = scalar_lea.vmem [#allocation7], %s1648_s25  ;;  %s1652_s11 = scalar_lea.vmem [#allocation8], %s1648_s25 }
  0x70   : > { %1410 = dma.done.wait (%p1568_p4), %s315_s27, 128  }
  0x71   : > { %1412 = vsyncadd (%p1568_p4), %s315_s27, 4294967168  ;;  %v1057_v0 = vld [vmem:[%s1641_s24 + $0xa0] sm:$0xf]  ;;  %v1103_v1 = vld [vmem:[%s1641_s24 + $0xac] sm:$0xf0]  ;;  %vm532_vm0 = vcmask 785408  }
  0x72   : > { %v1101_v2 = vld [vmem:[%s1641_s24 + $0xa4] sm:$0xf]  ;;  %v1058_v3 = vor.u32 %v1103_v1, %v1057_v0  ;;  %v1059_v4 = vld [vmem:[%s1641_s24 + $0xb0] sm:$0xf0]  ;;  %v1065_v5 = vld [vmem:[%s1641_s24 + $0xa8] sm:$0xf] }
  0x73   : > { %v1104_v6 = vld [vmem:[%s1641_s24 + $0xb4] sm:$0xf0]  ;;  %v1062_v7 = vor.u32 %v1101_v2, %v1059_v4  ;;  %v1102_v9 = vld [vmem:[%s1641_s24 + $0xac] sm:$0xf]  ;;  %v1067_v10 = vld [vmem:[%s1641_s24 + $0xb8] sm:$0xf0] }
  0x74   : > { %v1066_v8 = vor.u32 %v1104_v6, %v1065_v5  ;;  %v1041_v11 = vld [vmem:[%s1641_s24 + $0x80] sm:$0xf]  ;;  %538 = vmatpush.bf16.msra.mxu0 %v1058_v3  ;;  %v1070_v12 = vor.u32 %v1102_v9, %v1067_v10  ;;  %v1099_v13 = vld [vmem:[%s1641_s24 + $0x8c] sm:$0xf0]  ;;  %v1097_v14 = vld [vmem:[%s1641_s24 + $0x84] sm:$0xf] }
  0x75   : > { %v1043_v15 = vld [vmem:[%s1641_s24 + $0x90] sm:$0xf0]  ;;  %551 = vmatpush.bf16.msra.mxu1 %v1062_v7  ;;  %v1042_v16 = vor.u32 %v1099_v13, %v1041_v11  ;;  %v1049_v18 = vld [vmem:[%s1641_s24 + $0x88] sm:$0xf]  ;;  %v1100_v19 = vld [vmem:[%s1641_s24 + $0x94] sm:$0xf0] }
  0x76   : > { %564 = vmatpush.bf16.msra.mxu2 %v1066_v8  ;;  %v1046_v17 = vor.u32 %v1097_v14, %v1043_v15  ;;  %v1098_v20 = vld [vmem:[%s1641_s24 + $0x8c] sm:$0xf]  ;;  %577 = vmatpush.bf16.msra.mxu3 %v1070_v12  ;;  %v1050_v21 = vor.u32 %v1100_v19, %v1049_v18  ;;  %v1051_v22 = vld [vmem:[%s1641_s24 + $0x98] sm:$0xf0]  ;;  %v1025_v23 = vld [vmem:[%s1641_s24 + $0x60] sm:$0xf] }
  0x77   : > { %v1095_v24 = vld [vmem:[%s1641_s24 + $0x6c] sm:$0xf0]  ;;  %v1054_v25 = vor.u32 %v1098_v20, %v1051_v22  ;;  %v1093_v26 = vld [vmem:[%s1641_s24 + $0x64] sm:$0xf]  ;;  %v1027_v27 = vld [vmem:[%s1641_s24 + $0x70] sm:$0xf0] }
  0x78   : > { %v1033_v28 = vld [vmem:[%s1641_s24 + $0x68] sm:$0xf]  ;;  %539 = vmatpush.bf16.msra.mxu0 %v1042_v16  ;;  %v1026_v29 = vor.u32 %v1095_v24, %v1025_v23  ;;  %v1096_v30 = vld [vmem:[%s1641_s24 + $0x74] sm:$0xf0]  ;;  %v1094_v31 = vld [vmem:[%s1641_s24 + $0x6c] sm:$0xf]  ;;  %v1030_v33 = vor.u32 %v1093_v26, %v1027_v27 }
  0x79   : > { %v1035_v32 = vld [vmem:[%s1641_s24 + $0x78] sm:$0xf0]  ;;  %552 = vmatpush.bf16.msra.mxu1 %v1046_v17  ;;  %v1034_v34 = vor.u32 %v1096_v30, %v1033_v28  ;;  %v1009_v35 = vld [vmem:[%s1641_s24 + $0x40] sm:$0xf]  ;;  %v1091_v36 = vld [vmem:[%s1641_s24 + $0x4c] sm:$0xf0] }
  0x7a   : > { %565 = vmatpush.bf16.msra.mxu2 %v1050_v21  ;;  %v1089_v37 = vld [vmem:[%s1641_s24 + $0x44] sm:$0xf]  ;;  %578 = vmatpush.bf16.msra.mxu3 %v1054_v25  ;;  %v1038_v38 = vor.u32 %v1094_v31, %v1035_v32  ;;  %v1011_v39 = vld [vmem:[%s1641_s24 + $0x50] sm:$0xf0]  ;;  %v1017_v40 = vld [vmem:[%s1641_s24 + $0x48] sm:$0xf]  ;;  %v1010_v44 = vor.u32 %v1091_v36, %v1009_v35 }
  0x7b   : > { %v1092_v41 = vld [vmem:[%s1641_s24 + $0x54] sm:$0xf0]  ;;  %v1090_v42 = vld [vmem:[%s1641_s24 + $0x4c] sm:$0xf]  ;;  %v1019_v43 = vld [vmem:[%s1641_s24 + $0x58] sm:$0xf0]  ;;  %v1014_v45 = vor.u32 %v1089_v37, %v1011_v39 }
  0x7c   : > { %540 = vmatpush.bf16.msra.mxu0 %v1026_v29  ;;  %v1018_v46 = vor.u32 %v1092_v41, %v1017_v40  ;;  %v993_v47 = vld [vmem:[%s1641_s24 + $0x20] sm:$0xf]  ;;  %v1087_v48 = vld [vmem:[%s1641_s24 + $0x2c] sm:$0xf0]  ;;  %v1085_v49 = vld [vmem:[%s1641_s24 + $0x24] sm:$0xf]  ;;  %v1022_v50 = vor.u32 %v1090_v42, %v1019_v43 }
  0x7d   : > { %553 = vmatpush.bf16.msra.mxu1 %v1030_v33  ;;  %v995_v51 = vld [vmem:[%s1641_s24 + $0x30] sm:$0xf0]  ;;  %v1001_v52 = vld [vmem:[%s1641_s24 + $0x28] sm:$0xf]  ;;  %v1088_v53 = vld [vmem:[%s1641_s24 + $0x34] sm:$0xf0]  ;;  %v994_v56 = vor.u32 %v1087_v48, %v993_v47 }
  0x7e   : > { %566 = vmatpush.bf16.msra.mxu2 %v1034_v34  ;;  %579 = vmatpush.bf16.msra.mxu3 %v1038_v38  ;;  %v1086_v54 = vld [vmem:[%s1641_s24 + $0x2c] sm:$0xf]  ;;  %v1003_v55 = vld [vmem:[%s1641_s24 + $0x38] sm:$0xf0]  ;;  %v998_v57 = vor.u32 %v1085_v49, %v995_v51  ;;  %v1002_v58 = vor.u32 %v1088_v53, %v1001_v52  ;;  %v977_v59 = vld [vmem:[%s1641_s24] sm:$0xf] }
  0x7f   : > { %v1083_v60 = vld [vmem:[%s1641_s24 + $0xc] sm:$0xf0]  ;;  %v1081_v61 = vld [vmem:[%s1641_s24 + $0x4] sm:$0xf]  ;;  %v1006_v62 = vor.u32 %v1086_v54, %v1003_v55  ;;  %v979_v63 = vld [vmem:[%s1641_s24 + $0x10] sm:$0xf0] }
  0x80   : > { %541 = vmatpush.bf16.msra.mxu0 %v1010_v44  ;;  %v985_v0 = vld [vmem:[%s1641_s24 + $0x8] sm:$0xf]  ;;  %v1084_v1 = vld [vmem:[%s1641_s24 + $0x14] sm:$0xf0]  ;;  %v1082_v2 = vld [vmem:[%s1641_s24 + $0xc] sm:$0xf]  ;;  %v978_v4 = vor.u32 %v1083_v60, %v977_v59  ;;  %v982_v5 = vor.u32 %v1081_v61, %v979_v63 }
  0x81   : > { %554 = vmatpush.bf16.msra.mxu1 %v1014_v45  ;;  %v987_v3 = vld [vmem:[%s1641_s24 + $0x18] sm:$0xf0]  ;;  %v986_v6 = vor.u32 %v1084_v1, %v985_v0  ;;  %v402_v9 = vld [vmem:[%s308_s23] sm:$0xf]  ;;  %vm588_vm1 = vcmask 1041408   ;;  %s328_s1 = scalar_lea.vmem [#allocation10], %s1648_s25 }
  0x82   : > { %567 = vmatpush.bf16.msra.mxu2 %v1018_v46  ;;  %580 = vmatpush.bf16.msra.mxu3 %v1022_v50  ;;  %v990_v7 = vor.u32 %v1082_v2, %v987_v3  ;;  %v377_v8 = vld [vmem:[#allocation2] sm:$0x1]  ;;  %v404_v10 = vperm.slane %v402_v9, 0  ;;  %v405_v11 = vperm.slane %v402_v9, 1  ;;  %v406_v18 = vperm.slane %v402_v9, 2  ;;  %s974_s13 = sshll.u32 %s1638_s6, 3 }
  0x83   : > { %v407_v19 = vperm.slane %v402_v9, 3  ;;  %s1105_s16 = sshll.u32 %s1559_s26, 3  ;;  %vm789_vm14 = vcmask 1045508   ;;  %s370_s24 = scalar_lea.vmem [#allocation11], %s974_s13  ;;  %vm791_vm15 = vcmask 1043456  }
  0x84   : > { %542 = vmatpush.bf16.msra.mxu0 %v994_v56  ;;  %s807_s8 = scalar_lea.hbm %s1805_s5, %s1105_s16  ;;  %s809_s25 = sshll.u32 %s370_s24, 4  ;;  %s810_s25 = int_to_ptr.vmem [resolvable:$true] %s809_s25 }
  0x85   : > { %555 = vmatpush.bf16.msra.mxu1 %v998_v57  ;;  %s811_s26 = sshll.u32 %s807_s8, 4  ;;  %s796_s23 = scalar_lea.sflag [#allocation4], %s1638_s6  ;;  %s812_s26 = int_to_ptr.hbm [resolvable:$true] %s811_s26 }
  0x86   : > { %568 = vmatpush.bf16.msra.mxu2 %v1002_v58  ;;  %581 = vmatpush.bf16.msra.mxu3 %v1006_v62  ;;  %s1371_s27 = sshra.s32 %s812_s26, 4  ;;  %s1372_s27 = int_to_ptr.hbm [resolvable:$true] %s1371_s27 }
  0x87   : > { %p1378_p3 = scmp.lt.s32.totalorder %s1372_s27, %s1805_s5 }
  0x88   : > { %543 = vmatpush.bf16.msra.mxu0 %v978_v4 }
  0x89   : > { %556 = vmatpush.bf16.msra.mxu1 %v982_v5 }
  0x8a   : > { %569 = vmatpush.bf16.msra.mxu2 %v986_v6  ;;  %582 = vmatpush.bf16.msra.mxu3 %v990_v7 }
  0x8b   : > { %1071 = vmatmul.msk.bf16.vlgmr.msra.gmra.mxu0 %vm532_vm0, %v377_v8 }
  0x8c   : > { %1072 = vmatmul.msk.bf16.vlgmr.msra.gmra.mxu1 %vm532_vm0, %v377_v8 }
  0x8d   : > { %1073 = vmatmul.msk.bf16.vlgmr.msra.gmra.mxu2 %vm532_vm0, %v377_v8  ;;  %1074 = vmatmul.msk.bf16.vlgmr.msra.gmra.mxu3 %vm532_vm0, %v377_v8 }
 0x108   : > { %v545_v12 = vpop.f32.mrf.mxu0 }
 0x109   : > { %v1708_v13 = vadd.f32 %v545_v12, %v404_v10  ;;  %v558_v14 = vpop.f32.mrf.mxu1 }
 0x10a   : > { %v1710_v15 = vadd.f32 %v558_v14, %v405_v11 }
 0x10b   : > { %v589_v16 = vsel %vm588_vm1, %v1708_v13, 0.0  ;;  %v600_v21 = vmul.f32 %v1708_v13, %v1708_v13 }
 0x10c   : > { %v632_v17 = vsel %vm588_vm1, %v1710_v15, 0.0  ;;  %590 = vadd.xlane.f32.xlu0 %v589_v16  ;;  %v643_v25 = vmul.f32 %v1710_v15, %v1710_v15 }
 0x10d   : > { %633 = vadd.xlane.f32.xlu1 %v632_v17  ;;  %v601_v29 = vsel %vm588_vm1, %v600_v21, 0.0 }
 0x10e   : > { %v644_v30 = vsel %vm588_vm1, %v643_v25, 0.0 }
 0x110   : > { %v571_v20 = vpop.f32.mrf.mxu2  ;;  %v547_v23 = vpop.f32.mrf.mxu0 }
 0x111   : > { %v1718_v22 = vadd.f32 %v571_v20, %v406_v18  ;;  %v584_v24 = vpop.f32.mrf.mxu3  ;;  %v560_v26 = vpop.f32.mrf.mxu1 }
 0x112   : > { %v1722_v27 = vadd.f32 %v584_v24, %v407_v19 }
 0x113   : > { %v675_v28 = vsel %vm588_vm1, %v1718_v22, 0.0  ;;  %v686_v31 = vmul.f32 %v1718_v22, %v1718_v22 }
 0x114   : > { %676 = vadd.xlane.f32.xlu2 %v675_v28  ;;  %602 = vadd.xlane.f32.xlu0 %v601_v29  ;;  %v729_v32 = vmul.f32 %v1722_v27, %v1722_v27  ;;  %v718_v35 = vsel %vm588_vm1, %v1722_v27, 0.0 }
 0x115   : > { %645 = vadd.xlane.f32.xlu1 %v644_v30  ;;  %v687_v36 = vsel %vm588_vm1, %v686_v31, 0.0 }
 0x116   : > { %v730_v37 = vsel %vm588_vm1, %v729_v32, 0.0 }
 0x118   : > { %v573_v33 = vpop.f32.mrf.mxu2 }
 0x119   : > { %v586_v34 = vpop.f32.mrf.mxu3 }
 0x11c   : > { %688 = vadd.xlane.f32.xlu2 %v687_v36  ;;  %719 = vadd.xlane.f32.xlu0 %v718_v35 }
 0x11d   : > { %731 = vadd.xlane.f32.xlu1 %v730_v37 }
 0x17f   : > { %v591_v38 = vpop.xlane.xlu0 %590 }
 0x180   : > { %v634_v39 = vpop.xlane.xlu1 %633  ;;  %v592_v40 = vrot.slane %v591_v38, 4 }
 0x181   : > { %v635_v41 = vrot.slane %v634_v39, 4 }
 0x182   : > { %v593_v42 = vadd.f32 %v592_v40, %v591_v38 }
 0x183   : > { %v636_v43 = vadd.f32 %v635_v41, %v634_v39 }
 0x184   : > { %v594_v44 = vrot.slane %v593_v42, 2 }
 0x185   : > { %v637_v47 = vrot.slane %v636_v43, 2 }
 0x186   : > { %v595_v46 = vadd.f32 %v594_v44, %v593_v42 }
 0x187   : > { %v677_v45 = vpop.xlane.xlu2 %676  ;;  %v603_v49 = vpop.xlane.xlu0 %602  ;;  %v638_v59 = vadd.f32 %v637_v47, %v636_v43 }
 0x188   : > { %v678_v48 = vrot.slane %v677_v45, 4  ;;  %v646_v50 = vpop.xlane.xlu1 %645  ;;  %v604_v51 = vrot.slane %v603_v49, 4  ;;  %v596_v52 = vrot.slane %v595_v46, 1 }
 0x189   : > { %v647_v54 = vrot.slane %v646_v50, 4  ;;  %v639_v3 = vrot.slane %v638_v59, 1 }
 0x18a   : > { %v679_v53 = vadd.f32 %v678_v48, %v677_v45  ;;  %v605_v55 = vadd.f32 %v604_v51, %v603_v49  ;;  %v597_v56 = vadd.f32 %v596_v52, %v595_v46 }
 0x18b   : > { %v648_v58 = vadd.f32 %v647_v54, %v646_v50  ;;  %v640_v18 = vadd.f32 %v639_v3, %v638_v59 }
 0x18c   : > { %v680_v57 = vrot.slane %v679_v53, 2  ;;  %v606_v60 = vrot.slane %v605_v55, 2  ;;  %1108 = vpush %v597_v56 }
 0x18d   : > { %v649_v61 = vrot.slane %v648_v58, 2 }
 0x18e   : > { %v681_v62 = vadd.f32 %v680_v57, %v679_v53  ;;  %v607_v0 = vadd.f32 %v606_v60, %v605_v55 }
 0x18f   : > { %v689_v63 = vpop.xlane.xlu2 %688  ;;  %v720_v2 = vpop.xlane.xlu0 %719  ;;  %v650_v4 = vadd.f32 %v649_v61, %v648_v58 }
 0x190   : > { %v690_v1 = vrot.slane %v689_v63, 4  ;;  %v732_v5 = vpop.xlane.xlu1 %731  ;;  %v721_v6 = vrot.slane %v720_v2, 4  ;;  %v608_v7 = vrot.slane %v607_v0, 1  ;;  %v682_v11 = vrot.slane %v681_v62, 1 }
 0x191   : > { %v733_v9 = vrot.slane %v732_v5, 4  ;;  %v651_v10 = vrot.slane %v650_v4, 1 }
 0x192   : > { %v691_v8 = vadd.f32 %v690_v1, %v689_v63  ;;  %v722_v12 = vadd.f32 %v721_v6, %v720_v2  ;;  %v609_v14 = vadd.f32 %v608_v7, %v607_v0  ;;  %v683_v24 = vadd.f32 %v682_v11, %v681_v62 }
 0x193   : > { %v734_v17 = vadd.f32 %v733_v9, %v732_v5  ;;  %v652_v19 = vadd.f32 %v651_v10, %v650_v4 }
 0x194   : > { %v692_v16 = vrot.slane %v691_v8, 2  ;;  %v723_v20 = vrot.slane %v722_v12, 2  ;;  %1110 = vpush %v609_v14 }
 0x195   : > { %v735_v23 = vrot.slane %v734_v17, 2  ;;  %1112 = vpush %v640_v18 }
 0x196   : > { %v693_v21 = vadd.f32 %v692_v16, %v691_v8  ;;  %v724_v25 = vadd.f32 %v723_v20, %v722_v12  ;;  %1114 = vpush %v652_v19  ;;  %v627_v16 = vld [vmem:[%s1652_s11] sm:$0x1]  ;;  %v670_v19 = vld [vmem:[%s1652_s11 + $0x1] sm:$0x1] }
 0x197   : > { %v736_v26 = vadd.f32 %v735_v23, %v734_v17  ;;  %1116 = vpush %v683_v24 }
 0x198   : > { %v694_v28 = vrot.slane %v693_v21, 1  ;;  %v725_v29 = vrot.slane %v724_v25, 1 }
 0x199   : > { %v737_v31 = vrot.slane %v736_v26, 1 }
 0x19a   : > { %v695_v30 = vadd.f32 %v694_v28, %v693_v21  ;;  %v726_v32 = vadd.f32 %v725_v29, %v724_v25  ;;  %v672_v29 = vld [vmem:[%s328_s1 + $0x1] sm:$0x1] }
 0x19b   : > { %v738_v33 = vadd.f32 %v737_v31, %v736_v26  ;;  %v713_v31 = vld [vmem:[%s1652_s11 + $0x2] sm:$0x1] }
 0x19c   : > { %1118 = vpush %v695_v30 }
 0x19d   : > { %1120 = vpush %v726_v32 }
 0x19e   : > { %1122 = vpush %v738_v33 }
 0x1bd   : > { %s1109_s10 = spop %1108 }
 0x1be   : > { %v599_v34 = vstv %s1109_s10 }
 0x1bf   : > { %v1736_v35 = vmul.f32 0.015625, %v599_v34 }
 0x1c1   : > { %v614_v37 = vmul.f32 %v1736_v35, %v1736_v35 }
 0x1c5   : > { %s1111_s3 = spop %1110 }
 0x1c6   : > { %v611_v36 = vstv %s1111_s3  ;;  %s1113_s30 = spop %1112 }
 0x1c7   : > { %v613_v38 = vmul.f32 0.015625, %v611_v36  ;;  %v642_v39 = vstv %s1113_s30  ;;  %s1115_s9 = spop %1114  ;;  %s1377_s30 = scalar_lea.hbm %s1805_s5, 16 }
 0x1c8   : > { %v1740_v40 = vmul.f32 0.015625, %v642_v39  ;;  %v654_v41 = vstv %s1115_s9  ;;  %s1117_s0 = spop %1116 }
 0x1c9   : > { %v615_v42 = vsub.f32 %v613_v38, %v614_v37  ;;  %v685_v43 = vstv %s1117_s0  ;;  %v656_v45 = vmul.f32 0.015625, %v654_v41  ;;  %v629_v38 = vld [vmem:[%s328_s1] sm:$0x1] }
 0x1ca   : > { %v657_v44 = vmul.f32 %v1740_v40, %v1740_v40  ;;  %v1744_v46 = vmul.f32 0.015625, %v685_v43  ;;  %v756_v43 = vld [vmem:[%s1652_s11 + $0x3] sm:$0x1]  ;;  %s1373_s11 = scalar_lea.hbm %s1372_s27, 8 }
 0x1cb   : > { %v616_v47 = vadd.f32 1e-05, %v615_v42  ;;  %p1374_p6 = scmp.ne.s32.totalorder %s1372_s27, %s1373_s11  ;;  %p1379_p13 = scmp.lt.s32.totalorder %s1377_s30, %s1373_s11 }
 0x1cc   : > { %v658_v48 = vsub.f32 %v656_v45, %v657_v44  ;;  %v700_v51 = vmul.f32 %v1744_v46, %v1744_v46  ;;  %v715_v44 = vld [vmem:[%s328_s1 + $0x2] sm:$0x1] }
 0x1cd   : > { %s1119_s17 = spop %1118  ;;  %1199 = vrsqrt.f32 %v616_v47  ;;  %vm623_vm3 = vweird.f32 %v616_v47  ;;  %p1375_p4 = pnand %p1374_p6, %p1576_p7 }
 0x1ce   : > { %v697_v49 = vstv %s1119_s17  ;;  %s1121_s28 = spop %1120  ;;  %v659_v50 = vadd.f32 1e-05, %v658_v48  ;;  %p1380_p12 = por %p1379_p13, %p1378_p3 }
 0x1cf   : > { %v699_v52 = vmul.f32 0.015625, %v697_v49  ;;  %v728_v53 = vstv %s1121_s28  ;;  %s1123_s29 = spop %1122  ;;  %p1376_p11 = pneg %p1375_p4 }
 0x1d0   : > { %v1748_v54 = vmul.f32 0.015625, %v728_v53  ;;  %v740_v55 = vstv %s1123_s29  ;;  %1201 = vrsqrt.f32 %v659_v50  ;;  %vm666_vm6 = vweird.f32 %v659_v50 }
 0x1d1   : > { %v701_v56 = vsub.f32 %v699_v52, %v700_v51  ;;  %v742_v58 = vmul.f32 0.015625, %v740_v55  ;;  %v758_v52 = vld [vmem:[%s328_s1 + $0x3] sm:$0x1]  ;;  %p1381_p1 = pnand %p1380_p12, %p1376_p11 }
 0x1d2   : > { %v743_v57 = vmul.f32 %v1748_v54, %v1748_v54 }
 0x1d3   : > { %v702_v59 = vadd.f32 1e-05, %v701_v56  ;;  %v1200_v60 = vpop.eup %1199 }
 0x1d4   : > { %v744_v61 = vsub.f32 %v742_v58, %v743_v57  ;;  %v618_v62 = vmul.f32 %v1200_v60, %v616_v47  ;;  %vm624_vm2 = vweird.f32 %v1200_v60 }
 0x1d5   : > { %1203 = vrsqrt.f32 %v702_v59  ;;  %vm625_vm4 = vmor %vm623_vm3, %vm624_vm2  ;;  %vm709_vm9 = vweird.f32 %v702_v59 }
 0x1d6   : > { %v745_v63 = vadd.f32 1e-05, %v744_v61  ;;  %v1202_v0 = vpop.eup %1201  ;;  %v619_v1 = vmul.f32 %v1200_v60, %v618_v62 }
 0x1d7   : > { %v661_v2 = vmul.f32 %v1202_v0, %v659_v50  ;;  %vm667_vm5 = vweird.f32 %v1202_v0 }
 0x1d8   : > { %1205 = vrsqrt.f32 %v745_v63  ;;  %v620_v3 = vmul.f32 0.5, %v619_v1  ;;  %vm668_vm7 = vmor %vm666_vm6, %vm667_vm5  ;;  %vm752_vm12 = vweird.f32 %v745_v63 }
 0x1d9   : > { %v662_v4 = vmul.f32 %v1202_v0, %v661_v2 }
 0x1da   : > { %v621_v6 = vsub.f32 1.5, %v620_v3 }
 0x1db   : > { %v1204_v5 = vpop.eup %1203  ;;  %v663_v7 = vmul.f32 0.5, %v662_v4 }
 0x1dc   : > { %v704_v8 = vmul.f32 %v1204_v5, %v702_v59  ;;  %v622_v9 = vmul.f32 %v1200_v60, %v621_v6  ;;  %vm710_vm8 = vweird.f32 %v1204_v5 }
 0x1dd   : > { %v664_v11 = vsub.f32 1.5, %v663_v7  ;;  %vm711_vm10 = vmor %vm709_vm9, %vm710_vm8 }
 0x1de   : > { %v1206_v10 = vpop.eup %1205  ;;  %v705_v12 = vmul.f32 %v1204_v5, %v704_v8  ;;  %v626_v14 = vsel %vm625_vm4, %v1200_v60, %v622_v9 }
 0x1df   : > { %v747_v17 = vmul.f32 %v1206_v10, %v745_v63  ;;  %v665_v18 = vmul.f32 %v1202_v0, %v664_v11  ;;  %v628_v23 = vmul.f32 %v627_v16, %v626_v14  ;;  %vm753_vm11 = vweird.f32 %v1206_v10 }
 0x1e0   : > { %v706_v20 = vmul.f32 0.5, %v705_v12  ;;  %vm754_vm13 = vmor %vm752_vm12, %vm753_vm11 }
 0x1e1   : > { %v748_v21 = vmul.f32 %v1206_v10, %v747_v17  ;;  %v669_v24 = vsel %vm668_vm7, %v1202_v0, %v665_v18  ;;  %v630_v34 = vmul.f32 %v628_v23, %v1736_v35  ;;  %v761_v53 = vperm.slane %v628_v23, 0 }
 0x1e2   : > { %v707_v25 = vsub.f32 1.5, %v706_v20  ;;  %v671_v26 = vmul.f32 %v670_v19, %v669_v24 }
 0x1e3   : > { %v749_v28 = vmul.f32 0.5, %v748_v21  ;;  %v631_v49 = vsub.f32 %v629_v38, %v630_v34  ;;  %v765_v62 = vmul.f32 %v761_v53, %v1708_v13 }
 0x1e4   : > { %v708_v30 = vmul.f32 %v1204_v5, %v707_v25  ;;  %v673_v32 = vmul.f32 %v671_v26, %v1740_v40  ;;  %v762_v36 = vperm.slane %v671_v26, 0 }
 0x1e5   : > { %v750_v33 = vsub.f32 1.5, %v749_v28  ;;  %v769_v60 = vperm.slane %v631_v49, 0 }
 0x1e6   : > { %v712_v37 = vsel %vm711_vm10, %v1204_v5, %v708_v30  ;;  %v674_v39 = vsub.f32 %v672_v29, %v673_v32  ;;  %v766_v35 = vmul.f32 %v762_v36, %v1710_v15 }
 0x1e7   : > { %v714_v41 = vmul.f32 %v713_v31, %v712_v37  ;;  %v751_v42 = vmul.f32 %v1206_v10, %v750_v33  ;;  %v773_v1 = vadd.f32 %v769_v60, %v765_v62 }
 0x1e8   : > { %v770_v45 = vperm.slane %v674_v39, 0 }
 0x1e9   : > { %v716_v47 = vmul.f32 %v714_v41, %v1744_v46  ;;  %v763_v40 = vperm.slane %v714_v41, 0  ;;  %v755_v48 = vsel %vm754_vm13, %v1206_v10, %v751_v42  ;;  %v777_v13 = vmax.f32 %v773_v1, 0.0 }
 0x1ea   : > { %v757_v50 = vmul.f32 %v756_v43, %v755_v48  ;;  %v774_v57 = vadd.f32 %v770_v45, %v766_v35 }
 0x1eb   : > { %v717_v51 = vsub.f32 %v715_v44, %v716_v47  ;;  %v767_v58 = vmul.f32 %v763_v40, %v1718_v22 }
 0x1ec   : > { %v759_v55 = vmul.f32 %v757_v50, %v1748_v54  ;;  %v764_v56 = vperm.slane %v757_v50, 0  ;;  %v778_v0 = vmax.f32 %v774_v57, 0.0 }
 0x1ed   : > { %v771_v59 = vperm.slane %v717_v51, 0 }
 0x1ee   : > { %v760_v46 = vsub.f32 %v758_v52, %v759_v55  ;;  %v768_v15 = vmul.f32 %v764_v56, %v1722_v27  ;;  %v785_v54 = vrot.slane %v778_v0, 6 }
 0x1ef   : > { %v775_v61 = vadd.f32 %v771_v59, %v767_v58 }
 0x1f0   : > { %v772_v63 = vperm.slane %v760_v46, 0  ;;  %v788_v5 = vsel %vm588_vm1, %v777_v13, %v785_v54 }
 0x1f1   : > { %v779_v3 = vmax.f32 %v775_v61, 0.0 }
 0x1f2   : > { %v776_v2 = vadd.f32 %v772_v63, %v768_v15 }
 0x1f3   : > { %v786_v4 = vrot.slane %v779_v3, 4 }
 0x1f4   : > { %v780_v22 = vmax.f32 %v776_v2, 0.0 }
 0x1f6   : > { %v787_v27 = vrot.slane %v780_v22, 2 }
 0x1f8   : > { %v790_v6 = vsel %vm789_vm14, %v786_v4, %v787_v27 }
 0x1f9   : > { %v792_v7 = vsel %vm791_vm15, %v788_v5, %v790_v6 }
 0x1fa   : > { %794 = vst [vmem:[%s370_s24] sm:$0xff] %v792_v7 }
 0x1fb   : > { %1384 = shalt.err (!%p1381_p1)
}
 0x1fc   : > { %1136 = dma.vmem_to_hbm [thread:$0]  (%p1576_p7), %s810_s25, 128, %s812_s26, %s796_s23  }
 0x1fd PF: > { %s823_s6 = sand.u32 1, %s1419_s18   ;;  %p1821_p2 = scmp.ge.s32.totalorder %s1431_s21, 2 }
 0x1fe   : > { %s824_s17 = scalar_lea.sflag [#allocation4], %s823_s6 }
 0x1ff   : > { %p1156_p5 = pnand %p1821_p2, %p1580_p9 }
 0x201   : > { %p1157_p10 = pneg %p1156_p5 }
 0x203   : > { %1414 = dma.done.wait (%p1157_p10), %s824_s17, 128  }
 0x204   : > { %1416 = vsyncadd (%p1157_p10), %s824_s17, 4294967168  ;;  %s1822_s28 = sld [smem:[#allocation16_spill]]  ;;  %p22_p8 = scmp.ge.s32.totalorder %s1488_s22, 4  }
 0x205   : > { %s1823_s18 = smov %s1423_s19  ;;  %s1824_s19 = smov %s1427_s20 }
 0x206   : > { %s1826_s21 = smov %s1488_s22  ;;  %24 = sbr.rel (!%p22_p8) target bundleno = 12 (0xc), region = 125 }
 0x20a   : > { %s1825_s20 = smov %s1822_s28 }
 0x20b   :  { %830 = vsyncpa [#allocation3], 1 }
 0x20c   :  { %832 = vsyncpa [#allocation3 + $0x1], 1 }
 0x20d   :  { %833 = vsyncpa [#allocation6], 1 }
 0x20e   :  { %835 = vsyncpa [#allocation6 + $0x1], 1 }
 0x20f   :  { %836 = vsyncpa [#allocation9], 1 }
 0x210   :  { %838 = vsyncpa [#allocation9 + $0x1], 1 }
 0x211   :  { %839 = vsyncpa [#allocation4], 1 }
 0x212   :  { %841 = vsyncpa [#allocation4 + $0x1], 1 }

</bundles_post_ra>
